<compile_context>
chip_gen: v6e
topology: v6e:2x2x1
jax: 0.10.0
libtpu: 0.0.40
codegen_flags: <defaults>
</compile_context>

<pallas_src>
import jax
import jax.numpy as jnp
from jax.experimental import pallas as pl
from jax.experimental.pallas import tpu as pltpu

_LANE = 128
_MAX_BLOCK_BYTES = 4 << 20      # per-buffer block budget
_PALLAS_MIN_BYTES = 2 << 20     # below this, a standalone pallas_call is launch-bound


def _sublanes(dtype) -> int:
    # Sub-32-bit dtypes pack along sublanes: f32 -> 8, bf16/f16 -> 16, int8/fp8 -> 32.
    return max(8, 32 // jnp.dtype(dtype).itemsize)


def _silu_fused(x: jax.Array) -> jax.Array:
    xf = x.astype(jnp.float32)
    return (xf * jax.nn.sigmoid(xf)).astype(x.dtype)


def _silu_kernel(x_ref, o_ref):
    x = x_ref[...]
    xf = x.astype(jnp.float32)                       # vreg-only widening; free for a mem-bound op
    o_ref[...] = (xf * jax.nn.sigmoid(xf)).astype(o_ref.dtype)


def silu_pallas(x: jax.Array) -> jax.Array:
    """x * sigmoid(x): Pallas kernel on the aligned bulk, fused jnp on the ragged tail."""
    orig_shape = x.shape
    dtype = x.dtype
    n = x.size
    itemsize = jnp.dtype(dtype).itemsize
    subl = _sublanes(dtype)

    tile = subl * _LANE
    n_bulk = (n // tile) * tile
    if n_bulk == 0:                       # smaller than one vreg tile: nothing to tile
        return _silu_fused(x)

    x_flat = jnp.ravel(x)
    x_bulk = x_flat[:n_bulk]

    # Widest lane dim (multiple of 128) that tiles the bulk exactly -> large unmasked vst.
    lanes = _LANE
    for cand in (1024, 512, 256):
        if n_bulk % (subl * cand) == 0:
            lanes = cand
            break
    rows = n_bulk // lanes

    # Block sizing: as many rows as fit the byte budget, rounded to the sublane pack.
    bytes_per_row = lanes * itemsize
    block_rows = max(subl, (_MAX_BLOCK_BYTES // bytes_per_row) // subl * subl)
    block_rows = min(rows, block_rows)
    # If the whole (non-tiny) input fits one block, split so grid >= 2 and the
    # work shards across both TensorCores on v7x (near-free on 1-TC chips).
    if block_rows >= rows and rows >= 2 * subl:
        block_rows = pl.cdiv(pl.cdiv(rows, 2), subl) * subl
    grid = (pl.cdiv(rows, block_rows),)

    block_bytes = block_rows * lanes * itemsize
    # 2 arrays x 2 pipeline buffers x block_bytes, plus slack for compiler scratch.
    vmem_limit = min(48 << 20, max(16 << 20, 4 * block_bytes + (8 << 20)))

    cost = pl.CostEstimate(
        flops=2 * n_bulk,                        # mul + cheap VPU side of the logistic
        transcendentals=n_bulk,                  # one logistic per element (EUP)
        bytes_accessed=2 * n_bulk * itemsize,    # read + write, native dtype, bulk only
    )

    out2d = pl.pallas_call(
        _silu_kernel,
        out_shape=jax.ShapeDtypeStruct((rows, lanes), dtype),
        grid_spec=pltpu.PrefetchScalarGridSpec(
            num_scalar_prefetch=0,
            grid=grid,
            in_specs=[pl.BlockSpec((block_rows, lanes), lambda i: (i, 0))],
            out_specs=pl.BlockSpec((block_rows, lanes), lambda i: (i, 0)),
        ),
        compiler_params=pltpu.CompilerParams(
            dimension_semantics=("parallel",),
            vmem_limit_bytes=vmem_limit,
        ),
        cost_estimate=cost,
    )(x_bulk.reshape(rows, lanes))

    out_flat = out2d.reshape(-1)
    if n_bulk != n:
        # Ragged tail (< one tile): fused jnp, no pad/slice HBM round-trips.
        out_flat = jnp.concatenate([out_flat, _silu_fused(x_flat[n_bulk:])])
    return out_flat.reshape(orig_shape)


def silu(x: jax.Array, *, force_pallas: bool = False) -> jax.Array:
    """Net.forward equivalent. Tiny inputs take the fused-XLA fallback."""
    if not force_pallas and x.size * jnp.dtype(x.dtype).itemsize < _PALLAS_MIN_BYTES:
        return _silu_fused(x)
    return silu_pallas(x)


if __name__ == "__main__":
    k0, k1 = jax.random.split(jax.random.PRNGKey(0))
    x = jax.random.normal(k0, (2, 4, 16, 16), dtype=jnp.float32)  # NCHW, matches Net.forward

    # Exercise the Pallas kernel explicitly (the shipped shape is tiny, so the
    # production wrapper would otherwise take the fused fallback).
    y = jax.block_until_ready(silu(x, force_pallas=True))
    y_ref = x * jax.nn.sigmoid(x)
    assert y.shape == x.shape and y.dtype == x.dtype
    assert jnp.allclose(y, y_ref, atol=1e-6, rtol=1e-6)

    # Ragged size: aligned bulk through the kernel, tail via fused jnp.
    xr = jax.random.normal(k1, (5, 1000), dtype=jnp.float32)
    yr = jax.block_until_ready(silu(xr, force_pallas=True))
    assert jnp.allclose(yr, xr * jax.nn.sigmoid(xr), atol=1e-6, rtol=1e-6)

    # Small-size fallback path (what Net.forward hits at this size).
    y_fb = jax.block_until_ready(silu(x))
    assert jnp.allclose(y_fb, y_ref, atol=1e-6, rtol=1e-6)

    print("KERNEL_OK")
</pallas_src>

<mosaic_0001>
module attributes {stable_mosaic.version = 11 : i64} {
  func.func @_silu_kernel(%arg0: i32, %arg1: memref<8x256xf32, #tpu.memory_space<vmem>>, %arg2: memref<8x256xf32, #tpu.memory_space<vmem>>) attributes {dimension_semantics = [#tpu.dimension_semantics<parallel>], iteration_bounds = array<i64: 1>, scalar_prefetch = 0 : i64, scratch_operands = 0 : i64, tpu.core_type = #tpu.core_type<tc>, window_params = [{transform_indices = @transform_0, window_bounds = array<i64: 8, 256>}, {transform_indices = @transform_1, window_bounds = array<i64: 8, 256>}]} {
    %c0 = arith.constant 0 : index
    %c0_0 = arith.constant 0 : index
    %0 = vector.load %arg1[%c0, %c0_0] : memref<8x256xf32, #tpu.memory_space<vmem>>, vector<8x256xf32>
    %1 = arith.negf %0 : vector<8x256xf32>
    %2 = math.exp %1 : vector<8x256xf32>
    %cst = arith.constant 1.000000e+00 : f32
    %3 = vector.broadcast %cst : f32 to vector<8x256xf32>
    %4 = arith.addf %3, %2 : vector<8x256xf32>
    %5 = arith.divf %3, %4 : vector<8x256xf32>
    %6 = arith.mulf %0, %5 : vector<8x256xf32>
    %c0_1 = arith.constant 0 : index
    %c0_2 = arith.constant 0 : index
    %7 = vector.load %arg2[%c0_1, %c0_2] : memref<8x256xf32, #tpu.memory_space<vmem>>, vector<8x256xf32>
    tpu.vector_store %arg2[%c0_1, %c0_2], %6 {strides = array<i32>} : memref<8x256xf32, #tpu.memory_space<vmem>>, vector<8x256xf32>,
    return
  }
  func.func @transform_0(%arg0: i32) -> (i32, i32) {
    %c0_i32 = arith.constant 0 : i32
    %c0_i32_0 = arith.constant 0 : i32
    return %arg0, %c0_i32 : i32, i32
  }
  func.func @transform_1(%arg0: i32) -> (i32, i32) {
    %c0_i32 = arith.constant 0 : i32
    %c0_i32_0 = arith.constant 0 : i32
    return %arg0, %c0_i32 : i32, i32
  }
}

</mosaic_0001>

<bundles_post_ra>
// kernel: tpu_custom_call.1
= control target key start
LH: loop header
LB: loop body
LE: loop exit
PB: predicated region body
PF: predicated region fallthrough
CT: control target
= control target key end

     0   :  { %6 = vsyncpa [#allocation3], 0  ;;  %s128_s0 = inlined_call_operand.hbm [shape: f32[8,256], index: 0, kind: input, shape index: {}]   ;;  %s129_s1 = inlined_call_operand.hbm [shape: f32[8,256], index: 1, kind: output, shape index: {}]  }
   0x1   :  { %7 = vsyncpa [#allocation4], 0  ;;  %s110_s6 = smov [#allocation2]  }
   0x2   :  { %s14_s7 = sshll.u32 %s110_s6, 4  ;;  %s15_s7 = int_to_ptr.vmem [resolvable:$true] %s14_s7 }
   0x3   :  { %s74_s8 = scalar_lea.vmem %s15_s7, 256  ;;  %p79_p1 = scmp.lt.s32.totalorder %s15_s7, %s15_s7 }
   0x4   :  { %p75_p0 = scmp.ne.s32.totalorder %s15_s7, %s74_s8  ;;  %p80_p2 = scmp.lt.s32.totalorder %s74_s8, %s74_s8 }
   0x6   :  { %p81_p3 = por %p80_p2, %p79_p1 }
   0x8   :  { %p82_p4 = pnand %p81_p3, %p75_p0 }
   0xa   :  { %85 = shalt.err (!%p82_p4)
}
   0xb   :  { %17 = dma.hbm_to_vmem [thread:$0]  %s128_s0, 256, %s15_s7, [#allocation3]  }
   0xc   :  { %106 = dma.done.wait [#allocation3], 256  }
   0xd   :  { %107 = vsyncadd [#allocation3], 4294967040  ;;  %v21_v0 = vld [vmem:[#allocation2] sm:$0xff]  ;;  %v22_v1 = vld [vmem:[#allocation2 + $0x8] sm:$0xff]  ;;  %s111_s11 = smov [#allocation5]  }
   0xe   :  { %v54_v2 = vmul.f32 -1.442695, %v21_v0  ;;  %v55_v3 = vmul.f32 -1.442695, %v22_v1  ;;  %s45_s12 = sshll.u32 %s111_s11, 4  ;;  %s46_s12 = int_to_ptr.vmem [resolvable:$true] %s45_s12 }
   0xf   :  { %s86_s0 = scalar_lea.vmem %s46_s12, 256  ;;  %p91_p6 = scmp.lt.s32.totalorder %s46_s12, %s46_s12 }
  0x10   :  { %58 = vpow2.f32 %v54_v2  ;;  %p87_p5 = scmp.ne.s32.totalorder %s46_s12, %s86_s0  ;;  %p92_p7 = scmp.lt.s32.totalorder %s86_s0, %s86_s0 }
  0x11   :  { %60 = vpow2.f32 %v55_v3 }
  0x12   :  { %p93_p8 = por %p92_p7, %p91_p6 }
  0x14   :  { %p94_p9 = pnand %p93_p8, %p87_p5 }
  0x1d   :  { %v59_v4 = vpop.eup %58 }
  0x1e   :  { %v61_v5 = vpop.eup %60  ;;  %v29_v6 = vadd.f32 1.0, %v59_v4 }
  0x1f   :  { %v30_v7 = vadd.f32 1.0, %v61_v5 }
  0x20   :  { %62 = vrcp.f32 %v29_v6 }
  0x21   :  { %64 = vrcp.f32 %v30_v7 }
  0x2d   :  { %v63_v8 = vpop.eup %62 }
  0x2e   :  { %v65_v9 = vpop.eup %64  ;;  %v35_v10 = vmul.f32 %v63_v8, %v21_v0 }
  0x2f   :  { %v36_v11 = vmul.f32 %v65_v9, %v22_v1 }
  0x30   :  { %37 = vst [vmem:[#allocation5] sm:$0xff] %v35_v10 }
  0x31   :  { %38 = vst [vmem:[#allocation5 + $0x8] sm:$0xff] %v36_v11 }
  0x32   :  { %97 = shalt.err (!%p94_p9)
}
  0x33   :  { %48 = dma.vmem_to_hbm [thread:$0]  %s46_s12, 256, %s129_s1, [#allocation4]  }
  0x34   :  { %108 = dma.done.wait [#allocation4], 256  }
  0x35   :  { %109 = vsyncadd [#allocation4], 4294967040 }
  0x36   :  { %52 = vsyncpa [#allocation3], 1 }
  0x37   :  { %53 = vsyncpa [#allocation4], 1 }

</bundles_post_ra>
